<compile_context>
chip_gen: v7x
topology: tpu7x:2x2x1
jax: 0.10.0
libtpu: 0.0.40
codegen_flags: <defaults>
</compile_context>

<pallas_src>
import functools

import jax
import jax.numpy as jnp
from jax import lax
from jax.experimental import pallas as pl
from jax.experimental.pallas import tpu as pltpu


# --------------------------------------------------------------------------- #
# Kernel
# --------------------------------------------------------------------------- #
def _model_kernel(
    x_ref,                      # (tile_b, input_size)  row-major batch tile
    w1_ref, t1_ref,             # (64, input_size), (64, 1)   BN-folded
    w2_ref, t2_ref,             # (32, 64),        (32, 1)    BN-folded
    w3_ref, t3_ref,             # (16, 32),        (16, 1)    BN-folded
    w4_ref, b4_ref,             # (16, 1),         (1, 1)
    out_ref,                    # (1, tile_b)  lane-dense output row
    *,
    compute_dtype,
):
    # fc1: contract both operands on their last dim (A @ B^T) so h1 comes out
    # feature-major [64, tile_b] with batch on the lane axis.  Kept in f32.
    x = x_ref[...].astype(jnp.float32)
    h1 = lax.dot_general(
        w1_ref[...], x,
        dimension_numbers=(((1,), (1,)), ((), ())),
        preferred_element_type=jnp.float32,
    )
    h1 = jnp.maximum(h1 + t1_ref[...], 0.0)                 # bn1 folded + relu

    # fc2 + bn2 + relu, then residual add of the first 32 features (sublane slice).
    h2 = jnp.dot(w2_ref[...], h1.astype(compute_dtype),
                 preferred_element_type=jnp.float32)
    h2 = jnp.maximum(h2 + t2_ref[...], 0.0) + h1[:32, :]

    # fc3 + bn3 + relu.
    h3 = jnp.dot(w3_ref[...], h2.astype(compute_dtype),
                 preferred_element_type=jnp.float32)
    h3 = jnp.maximum(h3 + t3_ref[...], 0.0)                 # (16, tile_b)

    # fc4 (16 -> 1): weighted sublane reduction -> (1, tile_b); final relu.
    out = jnp.sum(h3 * w4_ref[...], axis=0, keepdims=True) + b4_ref[...]
    out_ref[...] = jnp.maximum(out, 0.0).astype(out_ref.dtype)


# --------------------------------------------------------------------------- #
# Wrapper
# --------------------------------------------------------------------------- #
def _round_up(a, m):
    return (a + m - 1) // m * m


@functools.partial(jax.jit, static_argnames=("block_b", "compute_dtype"))
def improved_insurance_forward(x, params, *, block_b=2048, compute_dtype=jnp.float32):
    """x: [batch, input_size] (f32, or bf16 to halve the HBM read).
    params: PyTorch-oriented weights/BN stats (see init_params)."""
    eps = 1e-5
    batch, input_size = x.shape
    assert block_b % 128 == 0, "block_b must be a multiple of 128 (lane tile)"

    # ---- fold Linear bias + BatchNorm (eval) into weights + one shift per layer ----
    def fold(w, b, gamma, beta, mean, var):
        scale = gamma / jnp.sqrt(var + eps)                  # [out]
        return w * scale[:, None], (beta + scale * (b - mean)).reshape(-1, 1)

    w1, t1 = fold(params["w1"], params["b1"],
                  params["bn1_g"], params["bn1_b"], params["bn1_m"], params["bn1_v"])
    w2, t2 = fold(params["w2"], params["b2"],
                  params["bn2_g"], params["bn2_b"], params["bn2_m"], params["bn2_v"])
    w3, t3 = fold(params["w3"], params["b3"],
                  params["bn3_g"], params["bn3_b"], params["bn3_m"], params["bn3_v"])
    w4 = params["w4"].reshape(-1, 1)                         # (16, 1)
    b4 = params["b4"].reshape(1, 1)                          # (1, 1)

    # Only the fc2/fc3 MXU operands take compute_dtype (tiny one-time host casts);
    # fc1 and all elementwise/epilogue math stay f32 (accuracy + v5e-safe).
    w2 = w2.astype(compute_dtype)
    w3 = w3.astype(compute_dtype)

    # ---- batch tiling: no host pad / cast / transpose of x (each would add a full
    # HBM pass).  Pallas masks the ragged last block.  Keep >= 2 grid steps for
    # batch > 256 so the "parallel" axis can shard across both v7x TensorCores. ----
    if batch <= 256:
        tile_b = batch                                        # single full-dim block
    else:
        tile_b = min(block_b, _round_up(pl.cdiv(batch, 2), 128))
    grid = (pl.cdiv(batch, tile_b),)

    consts = (w1, t1, w2, t2, w3, t3, w4, b4)
    in_specs = [pl.BlockSpec((tile_b, input_size), lambda i: (i, 0))] + [
        # whole-array block, same block every step -> stays VMEM-resident
        pl.BlockSpec(c.shape, lambda i: (0, 0)) for c in consts
    ]
    out_specs = pl.BlockSpec((1, tile_b), lambda i: (0, i))   # lane-dense row tiles

    out = pl.pallas_call(
        functools.partial(_model_kernel, compute_dtype=compute_dtype),
        out_shape=jax.ShapeDtypeStruct((1, batch), jnp.float32),
        grid=grid,
        in_specs=in_specs,
        out_specs=out_specs,
        compiler_params=pltpu.CompilerParams(dimension_semantics=("parallel",)),
    )(x, *consts)
    return out.reshape(batch, 1)                              # free reshape of (1, N)


# --------------------------------------------------------------------------- #
# Params + pure-JAX reference (matches the PyTorch eval-mode forward)
# --------------------------------------------------------------------------- #
def init_params(key, input_size):
    """Deterministic synthetic init; weights kept in PyTorch [out, in] orientation."""
    dims = [(64, input_size), (32, 64), (16, 32), (1, 16)]    # (out, in)
    params = {}
    keys = jax.random.split(key, 8)
    ki = 0
    for idx, (dout, din) in enumerate(dims, start=1):
        bound = 1.0 / jnp.sqrt(float(din))
        params[f"w{idx}"] = jax.random.uniform(
            keys[ki], (dout, din), jnp.float32, -bound, bound)
        ki += 1
        params[f"b{idx}"] = jax.random.uniform(
            keys[ki], (dout,), jnp.float32, -bound, bound)
        ki += 1
    for idx, n in zip((1, 2, 3), (64, 32, 16)):
        params[f"bn{idx}_g"] = jnp.ones((n,), jnp.float32) * 1.1
        params[f"bn{idx}_b"] = jnp.ones((n,), jnp.float32) * 0.05
        params[f"bn{idx}_m"] = jnp.ones((n,), jnp.float32) * 0.02
        params[f"bn{idx}_v"] = jnp.ones((n,), jnp.float32) * 0.9
    return params


def reference_forward(x, params):
    eps = 1e-5

    def lin(h, w, b):
        return h @ w.T + b

    def bn(h, g, b, m, v):
        return (h - m) / jnp.sqrt(v + eps) * g + b

    h1 = jnp.maximum(bn(lin(x, params["w1"], params["b1"]),
                        params["bn1_g"], params["bn1_b"],
                        params["bn1_m"], params["bn1_v"]), 0.0)
    h2 = jnp.maximum(bn(lin(h1, params["w2"], params["b2"]),
                        params["bn2_g"], params["bn2_b"],
                        params["bn2_m"], params["bn2_v"]), 0.0)
    h2 = h2 + h1[:, :32]
    h3 = jnp.maximum(bn(lin(h2, params["w3"], params["b3"]),
                        params["bn3_g"], params["bn3_b"],
                        params["bn3_m"], params["bn3_v"]), 0.0)
    return jnp.maximum(lin(h3, params["w4"], params["b4"]), 0.0)


if __name__ == "__main__":
    key = jax.random.PRNGKey(0)
    k_x, k_x2, k_p = jax.random.split(key, 3)

    input_size = 32
    params = init_params(k_p, input_size)

    # --- tiny batch: single full-dim block ---
    x_small = jax.random.normal(k_x, (8, input_size), jnp.float32)
    out_small = jax.block_until_ready(improved_insurance_forward(x_small, params))
    ref_small = reference_forward(x_small, params)
    assert out_small.shape == (8, 1), out_small.shape
    assert jnp.allclose(out_small, ref_small, atol=1e-4, rtol=1e-4)

    # --- ragged batch: 2 grid steps, masked last block, parallel axis ---
    x_big = jax.random.normal(k_x2, (1000, input_size), jnp.float32)
    out_big = jax.block_until_ready(improved_insurance_forward(x_big, params))
    ref_big = reference_forward(x_big, params)
    assert out_big.shape == (1000, 1), out_big.shape
    assert jnp.allclose(out_big, ref_big, atol=1e-4, rtol=1e-4)

    # --- bf16 fc2/fc3 matmul-operand path (MXU-native on v5e/v6e/v7x) ---
    out_bf16 = jax.block_until_ready(
        improved_insurance_forward(x_big, params, compute_dtype=jnp.bfloat16))
    assert jnp.allclose(out_bf16, ref_big, atol=5e-2, rtol=5e-2)

    print("KERNEL_OK")
</pallas_src>

<mosaic_0001>
module attributes {stable_mosaic.version = 11 : i64} {
  func.func @_model_kernel(%arg0: i32, %arg1: memref<8x32xf32, #tpu.memory_space<vmem>>, %arg2: memref<64x32xf32, #tpu.memory_space<vmem>>, %arg3: memref<64x1xf32, #tpu.memory_space<vmem>>, %arg4: memref<32x64xf32, #tpu.memory_space<vmem>>, %arg5: memref<32x1xf32, #tpu.memory_space<vmem>>, %arg6: memref<16x32xf32, #tpu.memory_space<vmem>>, %arg7: memref<16x1xf32, #tpu.memory_space<vmem>>, %arg8: memref<16x1xf32, #tpu.memory_space<vmem>>, %arg9: memref<1x1xf32, #tpu.memory_space<vmem>>, %arg10: memref<1x8xf32, #tpu.memory_space<vmem>>) attributes {dimension_semantics = [#tpu.dimension_semantics<parallel>], iteration_bounds = array<i64: 1>, scalar_prefetch = 0 : i64, scratch_operands = 0 : i64, tpu.core_type = #tpu.core_type<tc>, window_params = [{transform_indices = @transform_0, window_bounds = array<i64: 8, 32>}, {pipeline_mode = #tpu.pipeline_mode<synchronous>, transform_indices = @transform_1, window_bounds = array<i64: 64, 32>}, {pipeline_mode = #tpu.pipeline_mode<synchronous>, transform_indices = @transform_2, window_bounds = array<i64: 64, 1>}, {pipeline_mode = #tpu.pipeline_mode<synchronous>, transform_indices = @transform_3, window_bounds = array<i64: 32, 64>}, {pipeline_mode = #tpu.pipeline_mode<synchronous>, transform_indices = @transform_4, window_bounds = array<i64: 32, 1>}, {pipeline_mode = #tpu.pipeline_mode<synchronous>, transform_indices = @transform_5, window_bounds = array<i64: 16, 32>}, {pipeline_mode = #tpu.pipeline_mode<synchronous>, transform_indices = @transform_6, window_bounds = array<i64: 16, 1>}, {pipeline_mode = #tpu.pipeline_mode<synchronous>, transform_indices = @transform_7, window_bounds = array<i64: 16, 1>}, {pipeline_mode = #tpu.pipeline_mode<synchronous>, transform_indices = @transform_8, window_bounds = array<i64: 1, 1>}, {transform_indices = @transform_9, window_bounds = array<i64: 1, 8>}]} {
    %c0 = arith.constant 0 : index
    %c0_0 = arith.constant 0 : index
    %0 = vector.load %arg1[%c0, %c0_0] : memref<8x32xf32, #tpu.memory_space<vmem>>, vector<8x32xf32>
    %c0_1 = arith.constant 0 : index
    %c0_2 = arith.constant 0 : index
    %1 = vector.load %arg2[%c0_1, %c0_2] : memref<64x32xf32, #tpu.memory_space<vmem>>, vector<64x32xf32>
    %cst = arith.constant dense<0.000000e+00> : vector<64x8xf32>
    %2 = tpu.matmul %1, %0, %cst {dimension_numbers = #tpu.dot_dimension_numbers<[1], [1], [0], [0], [0, 0, 1, 0], [], []>} : vector<64x32xf32>, vector<8x32xf32>, vector<64x8xf32> -> vector<64x8xf32>
    %c0_3 = arith.constant 0 : index
    %c0_4 = arith.constant 0 : index
    %3 = vector.load %arg3[%c0_3, %c0_4] : memref<64x1xf32, #tpu.memory_space<vmem>>, vector<64x1xf32>
    %4 = vector.broadcast %3 : vector<64x1xf32> to vector<64x8xf32>
    %5 = arith.addf %2, %4 : vector<64x8xf32>
    %cst_5 = arith.constant 0.000000e+00 : f32
    %6 = vector.broadcast %cst_5 : f32 to vector<64x8xf32>
    %7 = arith.maximumf %5, %6 : vector<64x8xf32>
    %c0_6 = arith.constant 0 : index
    %c0_7 = arith.constant 0 : index
    %8 = vector.load %arg4[%c0_6, %c0_7] : memref<32x64xf32, #tpu.memory_space<vmem>>, vector<32x64xf32>
    %cst_8 = arith.constant dense<0.000000e+00> : vector<32x8xf32>
    %9 = tpu.matmul %8, %7, %cst_8 {dimension_numbers = #tpu.dot_dimension_numbers<[1], [0], [0], [1], [0, 0, 1, 1], [], []>} : vector<32x64xf32>, vector<64x8xf32>, vector<32x8xf32> -> vector<32x8xf32>
    %c0_9 = arith.constant 0 : index
    %c0_10 = arith.constant 0 : index
    %10 = vector.load %arg5[%c0_9, %c0_10] : memref<32x1xf32, #tpu.memory_space<vmem>>, vector<32x1xf32>
    %11 = vector.broadcast %10 : vector<32x1xf32> to vector<32x8xf32>
    %12 = arith.addf %9, %11 : vector<32x8xf32>
    %cst_11 = arith.constant 0.000000e+00 : f32
    %13 = vector.broadcast %cst_11 : f32 to vector<32x8xf32>
    %14 = arith.maximumf %12, %13 : vector<32x8xf32>
    %15 = vector.extract_strided_slice %7 {offsets = [0, 0], sizes = [32, 8], strides = [1, 1]} : vector<64x8xf32> to vector<32x8xf32>
    %16 = arith.addf %14, %15 : vector<32x8xf32>
    %c0_12 = arith.constant 0 : index
    %c0_13 = arith.constant 0 : index
    %17 = vector.load %arg6[%c0_12, %c0_13] : memref<16x32xf32, #tpu.memory_space<vmem>>, vector<16x32xf32>
    %cst_14 = arith.constant dense<0.000000e+00> : vector<16x8xf32>
    %18 = tpu.matmul %17, %16, %cst_14 {dimension_numbers = #tpu.dot_dimension_numbers<[1], [0], [0], [1], [0, 0, 1, 1], [], []>} : vector<16x32xf32>, vector<32x8xf32>, vector<16x8xf32> -> vector<16x8xf32>
    %c0_15 = arith.constant 0 : index
    %c0_16 = arith.constant 0 : index
    %19 = vector.load %arg7[%c0_15, %c0_16] : memref<16x1xf32, #tpu.memory_space<vmem>>, vector<16x1xf32>
    %20 = vector.broadcast %19 : vector<16x1xf32> to vector<16x8xf32>
    %21 = arith.addf %18, %20 : vector<16x8xf32>
    %cst_17 = arith.constant 0.000000e+00 : f32
    %22 = vector.broadcast %cst_17 : f32 to vector<16x8xf32>
    %23 = arith.maximumf %21, %22 : vector<16x8xf32>
    %c0_18 = arith.constant 0 : index
    %c0_19 = arith.constant 0 : index
    %24 = vector.load %arg8[%c0_18, %c0_19] : memref<16x1xf32, #tpu.memory_space<vmem>>, vector<16x1xf32>
    %25 = vector.broadcast %24 : vector<16x1xf32> to vector<16x8xf32>
    %26 = arith.mulf %23, %25 : vector<16x8xf32>
    %cst_20 = arith.constant dense<0.000000e+00> : vector<8xf32>
    %27 = vector.multi_reduction <add>, %26, %cst_20 [0] : vector<16x8xf32> to vector<8xf32>
    %28 = vector.shape_cast %27 : vector<8xf32> to vector<1x8xf32>
    %c0_21 = arith.constant 0 : index
    %c0_22 = arith.constant 0 : index
    %29 = vector.load %arg9[%c0_21, %c0_22] : memref<1x1xf32, #tpu.memory_space<vmem>>, vector<1x1xf32>
    %30 = vector.broadcast %29 : vector<1x1xf32> to vector<1x8xf32>
    %31 = arith.addf %28, %30 : vector<1x8xf32>
    %cst_23 = arith.constant 0.000000e+00 : f32
    %32 = vector.broadcast %cst_23 : f32 to vector<1x8xf32>
    %33 = arith.maximumf %31, %32 : vector<1x8xf32>
    %c0_24 = arith.constant 0 : index
    %c0_25 = arith.constant 0 : index
    %34 = vector.load %arg10[%c0_24, %c0_25] : memref<1x8xf32, #tpu.memory_space<vmem>>, vector<1x8xf32>
    tpu.vector_store %arg10[%c0_24, %c0_25], %33 {strides = array<i32>} : memref<1x8xf32, #tpu.memory_space<vmem>>, vector<1x8xf32>,
    return
  }
  func.func @transform_0(%arg0: i32) -> (i32, i32) {
    %c0_i32 = arith.constant 0 : i32
    %c0_i32_0 = arith.constant 0 : i32
    return %arg0, %c0_i32 : i32, i32
  }
  func.func @transform_1(%arg0: i32) -> (i32, i32) {
    %c0_i32 = arith.constant 0 : i32
    %c0_i32_0 = arith.constant 0 : i32
    %c0_i32_1 = arith.constant 0 : i32
    return %c0_i32, %c0_i32_0 : i32, i32
  }
  func.func @transform_2(%arg0: i32) -> (i32, i32) {
    %c0_i32 = arith.constant 0 : i32
    %c0_i32_0 = arith.constant 0 : i32
    %c0_i32_1 = arith.constant 0 : i32
    return %c0_i32, %c0_i32_0 : i32, i32
  }
  func.func @transform_3(%arg0: i32) -> (i32, i32) {
    %c0_i32 = arith.constant 0 : i32
    %c0_i32_0 = arith.constant 0 : i32
    %c0_i32_1 = arith.constant 0 : i32
    return %c0_i32, %c0_i32_0 : i32, i32
  }
  func.func @transform_4(%arg0: i32) -> (i32, i32) {
    %c0_i32 = arith.constant 0 : i32
    %c0_i32_0 = arith.constant 0 : i32
    %c0_i32_1 = arith.constant 0 : i32
    return %c0_i32, %c0_i32_0 : i32, i32
  }
  func.func @transform_5(%arg0: i32) -> (i32, i32) {
    %c0_i32 = arith.constant 0 : i32
    %c0_i32_0 = arith.constant 0 : i32
    %c0_i32_1 = arith.constant 0 : i32
    return %c0_i32, %c0_i32_0 : i32, i32
  }
  func.func @transform_6(%arg0: i32) -> (i32, i32) {
    %c0_i32 = arith.constant 0 : i32
    %c0_i32_0 = arith.constant 0 : i32
    %c0_i32_1 = arith.constant 0 : i32
    return %c0_i32, %c0_i32_0 : i32, i32
  }
  func.func @transform_7(%arg0: i32) -> (i32, i32) {
    %c0_i32 = arith.constant 0 : i32
    %c0_i32_0 = arith.constant 0 : i32
    %c0_i32_1 = arith.constant 0 : i32
    return %c0_i32, %c0_i32_0 : i32, i32
  }
  func.func @transform_8(%arg0: i32) -> (i32, i32) {
    %c0_i32 = arith.constant 0 : i32
    %c0_i32_0 = arith.constant 0 : i32
    %c0_i32_1 = arith.constant 0 : i32
    return %c0_i32, %c0_i32_0 : i32, i32
  }
  func.func @transform_9(%arg0: i32) -> (i32, i32) {
    %c0_i32 = arith.constant 0 : i32
    %c0_i32_0 = arith.constant 0 : i32
    return %c0_i32, %arg0 : i32, i32
  }
}

</mosaic_0001>

<bundles_post_ra>
// kernel: improved_insurance_forward.1
= control target key start
LH: loop header
LB: loop body
LE: loop exit
PB: predicated region body
PF: predicated region fallthrough
CT: control target
= control target key end

     0   :  { %s833_s0 = inlined_call_operand.vmem [shape: f32[8,32], index: 0, kind: input, shape index: {}]   ;;  %s834_s1 = inlined_call_operand.vmem [shape: f32[64,32], index: 1, kind: input, shape index: {}]   ;;  %s835_s2 = inlined_call_operand.vmem [shape: f32[64,1], index: 2, kind: input, shape index: {}]   ;;  %s836_s3 = inlined_call_operand.vmem [shape: f32[32,64], index: 3, kind: input, shape index: {}]   ;;  %s837_s4 = inlined_call_operand.vmem [shape: f32[32,1], index: 4, kind: input, shape index: {}]   ;;  %s838_s5 = inlined_call_operand.vmem [shape: f32[16,32], index: 5, kind: input, shape index: {}]   ;;  %s839_s6 = inlined_call_operand.vmem [shape: f32[16,1], index: 6, kind: input, shape index: {}]   ;;  %s840_s7 = inlined_call_operand.vmem [shape: f32[16,1], index: 7, kind: input, shape index: {}]   ;;  %s841_s8 = inlined_call_operand.<no memory space> [shape: f32[1,1], index: 8, kind: input, shape index: {}]   ;;  %s842_s9 = inlined_call_operand.hbm [shape: f32[1,8], index: 9, kind: output, shape index: {}]  }
   0x1   :  { %v14_v0 = vstv %s841_s8 }
   0x2   :  { %15 = vst [vmem:[#allocation2] sm:$0x1] %v14_v0 }
   0x3   :  { %v35_v1 = vld [vmem:[%s833_s0] sm:$0xff]  ;;  %vm92_vm0 = vcmask 261120   ;;  %v37_v3 = vld [vmem:[%s834_s1 + $0x8] sm:$0xff]  ;;  %v657_v4 = vmov 0   ;;  %v38_v5 = vld [vmem:[%s834_s1 + $0x10] sm:$0xff] }
   0x4   :  { %v36_v2 = vld [vmem:[%s834_s1] sm:$0xff]  ;;  %558 = vmatprep.subr.msk.mxu0 %vm92_vm0, %v35_v1  ;;  %631 = vset.pattern.permute.xlu0 %v657_v4  ;;  %v46_v7 = vld [vmem:[%s835_s2 + $0x10] sm:$0xff]  ;;  %v45_v8 = vld [vmem:[%s835_s2 + $0x8] sm:$0xff] }
   0x5   :  { %560 = vmatprep.mubr.msk.f32.mxu0 %vm92_vm0, %v36_v2  ;;  %559 = vmatpush3.xpose.msk.msra.mxu0 %vm92_vm0, %v35_v1  ;;  %v44_v6 = vld [vmem:[%s835_s2] sm:$0xff]  ;;  %v47_v9 = vld [vmem:[%s835_s2 + $0x18] sm:$0xff] }
   0x6   :  { %632 = vset.pattern.permute.xlu1 %v657_v4  ;;  %54 = vperm.xlu0 %631, %v44_v6   ;;  %v39_v10 = vld [vmem:[%s834_s1 + $0x18] sm:$0xff]  ;;  %v40_v11 = vld [vmem:[%s834_s1 + $0x20] sm:$0xff] }
   0x7   :  { %64 = vperm.xlu1 %632, %v46_v7  }
   0x8   :  { %561 = vmatmul.mubr.msk.f32.vlgmr.msra.gmra.mrb[0].mxu0 %vm92_vm0, %v37_v3 }
   0x9   :  { %563 = vmatprep.mubr.msk.f32.mxu0 %vm92_vm0, %v38_v5 }
   0xa   :  { %59 = vperm.xlu0 %631, %v45_v8  }
   0xb   :  { %69 = vperm.xlu1 %632, %v47_v9  }
   0xc   :  { %16 = vsyncpa [#allocation4], 0  ;;  %564 = vmatmul.mubr.msk.f32.gmra.mrb[2].mxu0 %vm92_vm0, %v39_v10  ;;  %v48_v12 = vld [vmem:[%s835_s2 + $0x20] sm:$0xff]  ;;  %v49_v13 = vld [vmem:[%s835_s2 + $0x28] sm:$0xff]  ;;  %vm261_vm1 = vcmask 523264   ;;  %vm478_vm2 = vcmask 64512  }
   0xd   :  { %566 = vmatprep.mubr.msk.f32.mxu0 %vm92_vm0, %v40_v11  ;;  %v41_v14 = vld [vmem:[%s834_s1 + $0x28] sm:$0xff]  ;;  %v42_v15 = vld [vmem:[%s834_s1 + $0x30] sm:$0xff]  ;;  %v51_v17 = vld [vmem:[%s835_s2 + $0x38] sm:$0xff]  ;;  %vm500_vm3 = vcmask 57344  }
   0xe   :  { %74 = vperm.xlu0 %631, %v48_v12   ;;  %v50_v16 = vld [vmem:[%s835_s2 + $0x30] sm:$0xff]  ;;  %v43_v18 = vld [vmem:[%s834_s1 + $0x38] sm:$0xff]  ;;  %v237_v19 = vld [vmem:[%s837_s4] sm:$0xff] }
   0xf   :  { %79 = vperm.xlu1 %632, %v49_v13   ;;  %v238_v20 = vld [vmem:[%s837_s4 + $0x8] sm:$0xff]  ;;  %v239_v21 = vld [vmem:[%s837_s4 + $0x10] sm:$0xff]  ;;  %v240_v22 = vld [vmem:[%s837_s4 + $0x18] sm:$0xff] }
  0x10   :  { %567 = vmatmul.mubr.msk.f32.gmra.mrb[4].mxu0 %vm92_vm0, %v41_v14  ;;  %v369_v23 = vld [vmem:[%s839_s6] sm:$0xff]  ;;  %v370_v24 = vld [vmem:[%s839_s6 + $0x8] sm:$0xff]  ;;  %v235_v2 = vld [vmem:[%s836_s3 + $0x10] sm:$0xff] }
  0x11   :  { %569 = vmatprep.mubr.msk.f32.mxu0 %vm92_vm0, %v42_v15  ;;  %v464_v25 = vld [vmem:[%s840_s7] sm:$0xff]  ;;  %v465_v26 = vld [vmem:[%s840_s7 + $0x8] sm:$0xff]  ;;  %v236_v3 = vld [vmem:[%s836_s3 + $0x18] sm:$0xff] }
  0x12   :  { %84 = vperm.xlu0 %631, %v50_v16   ;;  %v488_v27 = vld [vmem:[#allocation2] sm:$0x1]  ;;  %v234_v1 = vld [vmem:[%s836_s3 + $0x8] sm:$0xff] }
  0x13   :  { %89 = vperm.xlu1 %632, %v51_v17   ;;  %v233_v28 = vld [vmem:[%s836_s3] sm:$0xff] }
  0x14   :  { %570 = vmatmul.mubr.msk.f32.gmra.mrb[6].mxu0 %vm92_vm0, %v43_v18  ;;  %588 = vmatprep.mubr.msk.f32.mxu1 %vm261_vm1, %v233_v28  ;;  %v367_v4 = vld [vmem:[%s838_s5] sm:$0xff] }
  0x15   :  { %602 = vmatprep.mubr.msk.f32.mxu0 %vm92_vm0, %v367_v4 }
  0x16   :  { %243 = vperm.xlu0 %631, %v237_v19  }
  0x17   :  { %248 = vperm.xlu1 %632, %v238_v20  }
  0x1a   :  { %253 = vperm.xlu0 %631, %v239_v21  }
  0x1b   :  { %258 = vperm.xlu1 %632, %v240_v22  }
  0x1e   :  { %373 = vperm.xlu0 %631, %v369_v23  }
  0x1f   :  { %378 = vperm.xlu1 %632, %v370_v24  }
  0x22   :  { %468 = vperm.xlu0 %631, %v464_v25  }
  0x23   :  { %473 = vperm.xlu1 %632, %v465_v26  }
  0x26   :  { %491 = vperm.xlu0 %631, %v488_v27   ;;  %v368_v27 = vld [vmem:[%s838_s5 + $0x8] sm:$0xff]  ;;  %s658_s5 = smov [#allocation3]  }
  0x27   :  { %s508_s19 = sshll.u32 %s658_s5, 4  ;;  %s509_s19 = int_to_ptr.vmem [resolvable:$true] %s508_s19 }
  0x28   :  { %s633_s20 = scalar_lea.vmem %s509_s19, 16  ;;  %s637_s21 = scalar_lea.vmem %s509_s19, 32 }
  0x29   :  { %p634_p0 = scmp.ne.s32.totalorder %s509_s19, %s633_s20  ;;  %p638_p1 = scmp.lt.s32.totalorder %s509_s19, %s509_s19 }
  0x2a   :  { %p639_p2 = scmp.lt.s32.totalorder %s637_s21, %s633_s20 }
  0x2c   :  { %p640_p3 = por %p639_p2, %p638_p1 }
  0x2e   :  { %p641_p4 = pnand %p640_p3, %p634_p0 }
  0x85   :  { %v55_v29 = vpop.permute.xlu0 %54 }
  0x86   :  { %v65_v30 = vpop.permute.xlu1 %64 }
  0x89   :  { %v60_v31 = vpop.permute.xlu0 %59 }
  0x8a   :  { %v70_v32 = vpop.permute.xlu1 %69 }
  0x8d   :  { %v75_v45 = vpop.permute.xlu0 %74 }
  0x8e   :  { %v80_v42 = vpop.permute.xlu1 %79 }
  0x91   :  { %v85_v57 = vpop.permute.xlu0 %84 }
  0x92   :  { %v90_v54 = vpop.permute.xlu1 %89 }
  0x95   :  { %v244_v6 = vpop.permute.xlu0 %243 }
  0x96   :  { %v249_v5 = vpop.permute.xlu1 %248 }
  0x99   :  { %v254_v15 = vpop.permute.xlu0 %253 }
  0x9a   :  { %v259_v12 = vpop.permute.xlu1 %258 }
  0x9e   :  { %v379_v28 = vpop.permute.xlu1 %378 }
  0xdb   :  { %v562_v33 = vpop.f32.mrb[0].mxu0 }
  0xdc   :  { %v192_v34 = vadd.f32 %v562_v33, %v60_v31  ;;  %v186_v35 = vpop.f32.mrb[1].mxu0 }
  0xdd   :  { %v187_v36 = vadd.f32 %v186_v35, %v55_v29  ;;  %v374_v29 = vpop.permute.xlu0 %373  ;;  %v474_v35 = vpop.permute.xlu1 %473 }
  0xde   :  { %v226_v37 = vmax.f32 %v192_v34, 0.0 }
  0xdf   :  { %v225_v38 = vmax.f32 %v187_v36, 0.0  ;;  %v565_v39 = vpop.f32.mrb[2].mxu0 }
  0xe0   :  { %v202_v40 = vadd.f32 %v565_v39, %v70_v32  ;;  %v196_v41 = vpop.f32.mrb[3].mxu0 }
  0xe1   :  { %v197_v43 = vadd.f32 %v196_v41, %v65_v30  ;;  %v605_v44 = vpack.c.bf16 %v226_v37, %v225_v38 }
  0xe2   :  { %v228_v46 = vmax.f32 %v202_v40, 0.0 }
  0xe3   :  { %v227_v47 = vmax.f32 %v197_v43, 0.0  ;;  %v568_v48 = vpop.f32.mrb[4].mxu0  ;;  %606 = vmatprep.subr.bf16.mxu1 %v605_v44 }
  0xe4   :  { %v212_v49 = vadd.f32 %v568_v48, %v80_v42  ;;  %v206_v50 = vpop.f32.mrb[5].mxu0  ;;  %608 = vmatpush3.bf16.msra.mxu1 %v605_v44  ;;  %v494_v42 = vlaneseq }
  0xe5   :  { %v609_v51 = vpack.c.bf16 %v228_v46, %v227_v47  ;;  %v207_v52 = vadd.f32 %v206_v50, %v75_v45 }
  0xe6   :  { %v230_v53 = vmax.f32 %v212_v49, 0.0  ;;  %v495_v45 = vshrl.u32 %v494_v42, 7 }
  0xe7   :  { %v229_v55 = vmax.f32 %v207_v52, 0.0  ;;  %v571_v56 = vpop.f32.mrb[6].mxu0  ;;  %610 = vmatprep.subr.bf16.mxu1 %v609_v51 }
  0xe8   :  { %v222_v58 = vadd.f32 %v571_v56, %v90_v54  ;;  %v216_v59 = vpop.f32.mrb[7].mxu0  ;;  %612 = vmatpush3.bf16.msra.mxu1 %v609_v51  ;;  %v496_v48 = vsub.s32 0, %v495_v45 }
  0xe9   :  { %v613_v60 = vpack.c.bf16 %v230_v53, %v229_v55  ;;  %v217_v61 = vadd.f32 %v216_v59, %v85_v57 }
  0xea   :  { %v232_v62 = vmax.f32 %v222_v58, 0.0 }
  0xeb   :  { %v231_v63 = vmax.f32 %v217_v61, 0.0  ;;  %614 = vmatprep.subr.bf16.mxu1 %v613_v60 }
  0xec   :  { %616 = vmatpush3.bf16.msra.mxu1 %v613_v60 }
  0xed   :  { %v617_v0 = vpack.c.bf16 %v232_v62, %v231_v63 }
  0xef   :  { %618 = vmatprep.subr.bf16.mxu1 %v617_v0 }
  0xf0   :  { %620 = vmatpush3.bf16.msra.mxu1 %v617_v0 }
  0xf3   :  { %589 = vmatmul.mubr.msk.f32.vlgmr.msra.gmra.mrb[0].mxu1 %vm261_vm1, %v234_v1 }
  0xf4   :  { %591 = vmatprep.mubr.msk.f32.mxu1 %vm261_vm1, %v235_v2 }
  0xf7   :  { %592 = vmatmul.mubr.msk.f32.gmra.mrb[2].mxu1 %vm261_vm1, %v236_v3 }
 0x1c6   :  { %v590_v7 = vpop.f32.mrb[0].mxu1 }
 0x1c7   :  { %v346_v8 = vadd.f32 %v590_v7, %v249_v5  ;;  %v340_v9 = vpop.f32.mrb[1].mxu1 }
 0x1c8   :  { %v341_v10 = vadd.f32 %v340_v9, %v244_v6 }
 0x1c9   :  { %v360_v11 = vmax.f32 %v346_v8, 0.0 }
 0x1ca   :  { %v359_v13 = vmax.f32 %v341_v10, 0.0  ;;  %v593_v14 = vpop.f32.mrb[2].mxu1 }
 0x1cb   :  { %v364_v16 = vadd.f32 %v360_v11, %v226_v37  ;;  %v356_v17 = vadd.f32 %v593_v14, %v259_v12  ;;  %v350_v18 = vpop.f32.mrb[3].mxu1  ;;  %v469_v37 = vpop.permute.xlu0 %468 }
 0x1cc   :  { %v363_v19 = vadd.f32 %v359_v13, %v225_v38  ;;  %v351_v20 = vadd.f32 %v350_v18, %v254_v15 }
 0x1cd   :  { %v362_v21 = vmax.f32 %v356_v17, 0.0 }
 0x1ce   :  { %v361_v22 = vmax.f32 %v351_v20, 0.0  ;;  %v621_v23 = vpack.c.bf16 %v364_v16, %v363_v19 }
 0x1cf   :  { %v366_v24 = vadd.f32 %v362_v21, %v228_v46  ;;  %v492_v50 = vpop.permute.xlu0 %491 }
 0x1d0   :  { %v365_v25 = vadd.f32 %v361_v22, %v227_v47  ;;  %622 = vmatprep.subr.bf16.mxu0 %v621_v23  ;;  %v497_v52 = vrot.slane %v492_v50, %v496_v48 }
 0x1d1   :  { %624 = vmatpush3.bf16.msra.mxu0 %v621_v23 }
 0x1d2   :  { %v625_v26 = vpack.c.bf16 %v366_v24, %v365_v25 }
 0x1d4   :  { %626 = vmatprep.subr.bf16.mxu0 %v625_v26 }
 0x1d5   :  { %628 = vmatpush3.bf16.msra.mxu0 %v625_v26 }
 0x1d8   :  { %603 = vmatmul.mubr.msk.f32.vlgmr.msra.gmra.mrb[8].mxu0 %vm92_vm0, %v368_v27 }
 0x2ab   :  { %v604_v30 = vpop.f32.mrb[8].mxu0 }
 0x2ac   :  { %v459_v31 = vadd.f32 %v604_v30, %v379_v28  ;;  %v453_v32 = vpop.f32.mrb[9].mxu0 }
 0x2ad   :  { %v454_v33 = vadd.f32 %v453_v32, %v374_v29 }
 0x2ae   :  { %v463_v34 = vmax.f32 %v459_v31, 0.0 }
 0x2af   :  { %v462_v36 = vmax.f32 %v454_v33, 0.0 }
 0x2b0   :  { %v477_v38 = vmul.f32 %v474_v35, %v463_v34 }
 0x2b1   :  { %v476_v39 = vmul.f32 %v469_v37, %v462_v36 }
 0x2b2   :  { %v480_v40 = vsel %vm478_vm2, %v477_v38, 0.0 }
 0x2b3   :  { %v479_v41 = vsel %vm478_vm2, %v476_v39, 0.0 }
 0x2b4   :  { %v481_v43 = vadd.f32 %v480_v40, %v479_v41 }
 0x2b6   :  { %v482_v44 = vrot.slane %v481_v43, 4 }
 0x2b8   :  { %v483_v46 = vadd.f32 %v482_v44, %v481_v43 }
 0x2ba   :  { %v484_v47 = vrot.slane %v483_v46, 2 }
 0x2bc   :  { %v485_v49 = vadd.f32 %v484_v47, %v483_v46 }
 0x2be   :  { %v486_v51 = vrot.slane %v485_v49, 1 }
 0x2c0   :  { %v487_v53 = vadd.f32 %v486_v51, %v485_v49 }
 0x2c2   :  { %v498_v54 = vadd.f32 %v497_v52, %v487_v53 }
 0x2c4   :  { %v499_v55 = vmax.f32 %v498_v54, 0.0 }
 0x2c6   :  { %501 = vst.msk [vmem:[#allocation3] sm:$0x1] %vm500_vm3, %v499_v55 }
 0x2c7   :  { %644 = shalt.err (!%p641_p4)
}
 0x2c8   :  { %s645_s2 = scalar_lea.hbm %s842_s9, 16 }
 0x2c9   :  { %p646_p5 = scmp.ne.s32.totalorder %s842_s9, %s645_s2  ;;  %p649_p6 = scmp.lt.u32.totalorder %s645_s2, %s842_s9 }
 0x2cb   :  { %p651_p7 = pnand %p649_p6, %p646_p5 }
 0x2cd   :  { %654 = shalt.err (!%p651_p7)
}
 0x2ce   :  { %511 = dma.vmem_to_hbm [thread:$0]  %s509_s19, 16, %s842_s9, [#allocation4]  }
 0x2cf   :  { %655 = dma.done.wait [#allocation4], 16  }
 0x2d0   :  { %656 = vsyncadd [#allocation4], 4294967280 }
 0x2d1   :  { %515 = vsyncpa [#allocation4], 1 }

</bundles_post_ra>
